<compile_context>
chip_gen: v7x
topology: tpu7x:2x2x1
jax: 0.10.0
libtpu: 0.0.40
codegen_flags: <defaults>
</compile_context>

<pallas_src>
import functools

import jax
import jax.numpy as jnp
from jax import lax
from jax.experimental import pallas as pl
from jax.experimental.pallas import tpu as pltpu

_LEAKY_SLOPE = 0.01
_BN_EPS = 1e-5
_HALF_LOG_2PI = 0.9189385332046727  # 0.5 * log(2*pi)


# ---------------------------------------------------------------------------
# Small in-kernel helpers (elementwise -> VPU/EUP)
# ---------------------------------------------------------------------------

def _round_up(x, m):
    return (x + m - 1) // m * m


def _leaky_relu(x):
    return jnp.where(x > 0, x, _LEAKY_SLOPE * x)


def _softplus(x):
    # torch.nn.Softplus(beta=1, threshold=20)
    return jnp.where(x > 20.0, x, jnp.log(1.0 + jnp.exp(jnp.minimum(x, 20.0))))


def _gamma_a_plus_1(a):
    """Gamma(a + 1) for a in [0, 30]  (== exp(lgamma(a)) * a).

    Stirling/de-Moivre series for lgamma evaluated at x = a + 3 >= 3 (well
    conditioned, ~2-3 ulp in f32), shifted down with two recurrences:
        Gamma(a + 1) = Gamma(a + 3) / ((a + 1) * (a + 2))
    Only 4 EUP ops (div, log, exp, div); the series is VPU Horner math.
    """
    x = a + 3.0
    inv = 1.0 / x
    inv2 = inv * inv
    series = inv * (8.3333333333333333e-2 + inv2 * (-2.7777777777777778e-3
                    + inv2 * (7.9365079365079365e-4
                              + inv2 * (-5.9523809523809524e-4))))
    lg = (x - 0.5) * jnp.log(x) - x + _HALF_LOG_2PI + series
    return jnp.exp(lg) / ((a + 1.0) * (a + 2.0))


def _valid_mask(shape, tile_p, p_valid):
    """Mask of shape `shape` (C, tile_p): True for real (non-padded) pixels."""
    col = lax.broadcasted_iota(jnp.int32, shape, dimension=1)
    return (pl.program_id(0) * tile_p + col) < p_valid


# ---------------------------------------------------------------------------
# Kernels
# ---------------------------------------------------------------------------

def _conv1_kernel(patches_ref, w1_ref, h1_ref, stats_ref, *, tile_p, p_valid):
    # 3x3 "valid" conv expressed as a matmul over im2col patches, + LeakyReLU.
    h1 = _leaky_relu(jnp.dot(w1_ref[...], patches_ref[...],
                             preferred_element_type=jnp.float32))
    h1_ref[...] = h1
    # One-pass BN statistics (sum, sum of squares) for this tile, masked so the
    # lane padding never pollutes the batch statistics.
    hm = jnp.where(_valid_mask(h1.shape, tile_p, p_valid), h1, 0.0)
    stats_ref[:, :, 0:1] = jnp.sum(hm, axis=1, keepdims=True)[None]
    stats_ref[:, :, 1:2] = jnp.sum(hm * hm, axis=1, keepdims=True)[None]


def _conv2_kernel(h1_ref, w2_ref, bn1_ref, h2_ref, stats_ref, *, tile_p, p_valid):
    # BatchNorm1 (precomputed mean / rstd) + 1x1 conv + LeakyReLU.
    h1n = (h1_ref[...] - bn1_ref[:, 0:1]) * bn1_ref[:, 1:2]
    h2 = _leaky_relu(jnp.dot(w2_ref[...], h1n, preferred_element_type=jnp.float32))
    h2_ref[...] = h2
    hm = jnp.where(_valid_mask(h2.shape, tile_p, p_valid), h2, 0.0)
    stats_ref[:, :, 0:1] = jnp.sum(hm, axis=1, keepdims=True)[None]
    stats_ref[:, :, 1:2] = jnp.sum(hm * hm, axis=1, keepdims=True)[None]


def _head_kernel(h2_ref, u_ref, wdec_ref, bn2_ref, alphas_ref, z_ref, out_ref):
    # BatchNorm2 + Softplus  => alphas
    h2n = (h2_ref[...] - bn2_ref[:, 0:1]) * bn2_ref[:, 1:2]
    alphas = _softplus(h2n)
    alphas_ref[...] = alphas

    # reparameterize:
    #   v = ((exp(lgamma(a)) * u + 1e-12) * a) ** (1 / max(a, 1e-8))
    #     = (Gamma(a + 1) * u + 1e-12 * a) ** (1 / max(a, 1e-8))
    a = jnp.minimum(alphas, 30.0)                      # clamp(max=30)
    arg = _gamma_a_plus_1(a) * u_ref[...] + 1e-12 * a  # > 0
    v = jnp.exp(jnp.log(arg) / jnp.maximum(a, 1e-8))

    # Dirichlet normalization over the channel (sublane) axis: one reciprocal
    # per pixel instead of one divide per element.
    inv = 1.0 / (jnp.sum(v, axis=0, keepdims=True) + 1e-8)
    z = v * inv
    z_ref[...] = z

    # decoder: 1x1 conv, bias-free
    out_ref[...] = jnp.dot(wdec_ref[...], z, preferred_element_type=jnp.float32)


# ---------------------------------------------------------------------------
# Plain-JAX glue
# ---------------------------------------------------------------------------

def _im2col_valid_3x3(x_nchw):
    """(N, C, H, W) -> (C*9, N*Ho*Wo) patches for a 3x3 'valid' conv.

    Row index is ci*9 + dh*3 + dw, matching torch weight.reshape(16, -1).
    TODO(synk): for large spatial sizes this 9x expansion should be replaced by
    an in-kernel halo conv; at W=16 the flattened-pixel layout wins on lanes.
    """
    N, C, H, W = x_nchw.shape
    Ho, Wo = H - 2, W - 2
    cols = [x_nchw[:, :, dh:dh + Ho, dw:dw + Wo]
            for dh in range(3) for dw in range(3)]
    p = jnp.stack(cols, axis=2)            # (N, C, 9, Ho, Wo)
    p = p.transpose(1, 2, 0, 3, 4)         # (C, 9, N, Ho, Wo)
    return p.reshape(C * 9, N * Ho * Wo)


def _bn_params(partial_stats, count, eps=_BN_EPS):
    """(nt, C, 2) per-tile [sum, sum_sq] -> (C, 2) [mean, 1/sqrt(var+eps)]."""
    s = jnp.sum(partial_stats[:, :, 0], axis=0)
    ss = jnp.sum(partial_stats[:, :, 1], axis=0)
    mean = s / count
    var = jnp.maximum(ss / count - mean * mean, 0.0)   # biased var (training BN)
    rstd = 1.0 / jnp.sqrt(var + eps)
    return jnp.stack([mean, rstd], axis=1)


def _uniform_noise(key, n_ems, n_pix):
    # TODO(synk): torch.rand_like's RNG stream cannot be reproduced bit-for-bit;
    # the U(0,1) noise is drawn deterministically from jax.random instead.
    return jax.random.uniform(key, (n_ems, n_pix), dtype=jnp.float32)


def init_params(key, n_bands, n_ems, init_value=0.1):
    """Encoder: scaled-normal init; decoder: constant init
    (matching _init_decoder_weights(init_mode='constant'))."""
    k1, k2 = jax.random.split(key)
    w1 = jax.random.normal(k1, (16, n_bands, 3, 3), jnp.float32) * (2.0 / (n_bands * 9)) ** 0.5
    w2 = jax.random.normal(k2, (n_ems, 16, 1, 1), jnp.float32) * (2.0 / 16.0) ** 0.5
    wdec = jnp.full((n_bands, n_ems, 1, 1), init_value, jnp.float32)
    return {"w1": w1, "w2": w2, "wdec": wdec}


def dir_cnn_vae_forward(x_nchw, params, noise_key, *, tile_p=2048):
    x = x_nchw.astype(jnp.float32)
    N, Cin, H, W = x.shape
    Ho, Wo = H - 2, W - 2
    P = N * Ho * Wo
    n_ems = params["w2"].shape[0]
    n_bands = params["wdec"].shape[0]
    c9 = Cin * 9

    tile = min(_round_up(tile_p, 128), _round_up(P, 128))   # lane axis multiple of 128
    p_pad = _round_up(P, tile)
    nt = p_pad // tile

    patches = jnp.pad(_im2col_valid_3x3(x), ((0, 0), (0, p_pad - P)))
    u = jnp.pad(_uniform_noise(noise_key, n_ems, P),
                ((0, 0), (0, p_pad - P)), constant_values=0.5)

    w1m = params["w1"].reshape(16, c9)
    w2m = params["w2"].reshape(n_ems, 16)
    wdecm = params["wdec"].reshape(n_bands, n_ems)

    cparams = pltpu.CompilerParams(
        dimension_semantics=("parallel",),       # pixel tiles are independent
        vmem_limit_bytes=32 * 1024 * 1024,       # tiles sized far below this
    )

    def tiled(c):
        return pl.BlockSpec((c, tile), lambda t: (0, t))

    def whole(shape):
        return pl.BlockSpec(shape, lambda t: tuple(0 for _ in shape))

    def stats_spec(c):
        return pl.BlockSpec((1, c, 2), lambda t: (t, 0, 0))

    # --- pass 1: conv3x3 (im2col matmul) + LeakyReLU -> h1, BN1 partial stats --
    h1, stats1 = pl.pallas_call(
        functools.partial(_conv1_kernel, tile_p=tile, p_valid=P),
        grid=(nt,),
        in_specs=[tiled(c9), whole((16, c9))],
        out_specs=(tiled(16), stats_spec(16)),
        out_shape=(jax.ShapeDtypeStruct((16, p_pad), jnp.float32),
                   jax.ShapeDtypeStruct((nt, 16, 2), jnp.float32)),
        compiler_params=cparams,
    )(patches, w1m)
    bn1 = _bn_params(stats1, P)

    # --- pass 2: BN1 + conv1x1 + LeakyReLU -> h2, BN2 partial stats -----------
    h2, stats2 = pl.pallas_call(
        functools.partial(_conv2_kernel, tile_p=tile, p_valid=P),
        grid=(nt,),
        in_specs=[tiled(16), whole((n_ems, 16)), whole((16, 2))],
        out_specs=(tiled(n_ems), stats_spec(n_ems)),
        out_shape=(jax.ShapeDtypeStruct((n_ems, p_pad), jnp.float32),
                   jax.ShapeDtypeStruct((nt, n_ems, 2), jnp.float32)),
        compiler_params=cparams,
    )(h1, w2m, bn1)
    bn2 = _bn_params(stats2, P)

    # --- pass 3: BN2 + Softplus + Dirichlet reparam + decoder -----------------
    alphas_f, z_f, out_f = pl.pallas_call(
        _head_kernel,
        grid=(nt,),
        in_specs=[tiled(n_ems), tiled(n_ems), whole((n_bands, n_ems)),
                  whole((n_ems, 2))],
        out_specs=(tiled(n_ems), tiled(n_ems), tiled(n_bands)),
        out_shape=(jax.ShapeDtypeStruct((n_ems, p_pad), jnp.float32),
                   jax.ShapeDtypeStruct((n_ems, p_pad), jnp.float32),
                   jax.ShapeDtypeStruct((n_bands, p_pad), jnp.float32)),
        compiler_params=cparams,
    )(h2, u, wdecm, bn2)

    def to_nchw(flat, c):
        return flat[:, :P].reshape(c, N, Ho, Wo).transpose(1, 0, 2, 3)

    return to_nchw(out_f, n_bands), to_nchw(z_f, n_ems), to_nchw(alphas_f, n_ems)


# ---------------------------------------------------------------------------
# Pure-JAX reference (lax.conv + lax.lgamma) for validation
# ---------------------------------------------------------------------------

def _reference_forward(x_nchw, params, noise_key):
    x = x_nchw.astype(jnp.float32)
    N, _, H, W = x.shape
    Ho, Wo = H - 2, W - 2
    n_ems = params["w2"].shape[0]

    def bn(h):
        m = jnp.mean(h, axis=(0, 2, 3), keepdims=True)
        v = jnp.mean((h - m) ** 2, axis=(0, 2, 3), keepdims=True)
        return (h - m) / jnp.sqrt(v + _BN_EPS)

    def conv(h, w):
        return lax.conv_general_dilated(
            h, w, (1, 1), "VALID", dimension_numbers=("NCHW", "OIHW", "NCHW"))

    h1 = bn(_leaky_relu(conv(x, params["w1"])))
    h2 = bn(_leaky_relu(conv(h1, params["w2"])))
    alphas = _softplus(h2)

    u = _uniform_noise(noise_key, n_ems, N * Ho * Wo)
    u = u.reshape(n_ems, N, Ho, Wo).transpose(1, 0, 2, 3)
    a = jnp.minimum(alphas, 30.0)
    int1 = 1.0 / jnp.maximum(a, 1e-8)
    int4 = jnp.exp(lax.lgamma(a)) * u + 1e-12
    v = jnp.power(int4 * a, int1)
    z = v / (jnp.sum(v, axis=1, keepdims=True) + 1e-8)
    out = conv(z, params["wdec"])
    return out, z, alphas


if __name__ == "__main__":
    key = jax.random.PRNGKey(0)
    k_x, k_p, k_u = jax.random.split(key, 3)

    n_bands, n_ems = 4, 4
    x = jax.random.normal(k_x, (2, n_bands, 16, 16), jnp.float32)   # NCHW
    params = init_params(k_p, n_bands, n_ems)

    output, z_latent, alphas = dir_cnn_vae_forward(x, params, k_u)
    jax.block_until_ready((output, z_latent, alphas))

    # valid 3x3 conv: 16 -> 14 spatial
    assert output.shape == (2, n_bands, 14, 14)
    assert z_latent.shape == (2, n_ems, 14, 14)
    assert alphas.shape == (2, n_ems, 14, 14)
    assert bool(jnp.all(jnp.isfinite(output)))
    assert bool(jnp.all(alphas > 0))                    # softplus output
    s = jnp.sum(z_latent, axis=1)                       # Dirichlet: ~sum to 1
    assert bool(jnp.all(jnp.abs(s - 1.0) < 1e-2))

    # Compare against an independent plain-XLA reference (lax.conv, lax.lgamma).
    ref_out, ref_z, ref_alphas = _reference_forward(x, params, k_u)
    assert float(jnp.max(jnp.abs(alphas - ref_alphas))) < 1e-3
    assert float(jnp.max(jnp.abs(z_latent - ref_z))) < 1e-2
    assert float(jnp.max(jnp.abs(output - ref_out))) < 1e-2

    print("KERNEL_OK")
</pallas_src>

<mosaic_0001>
module attributes {stable_mosaic.version = 11 : i64} {
  func.func @_conv1_kernel(%arg0: i32, %arg1: memref<36x512xf32, #tpu.memory_space<vmem>>, %arg2: memref<16x36xf32, #tpu.memory_space<vmem>>, %arg3: memref<16x512xf32, #tpu.memory_space<vmem>>, %arg4: memref<1x16x2xf32, #tpu.memory_space<vmem>>) attributes {dimension_semantics = [#tpu.dimension_semantics<parallel>], iteration_bounds = array<i64: 1>, scalar_prefetch = 0 : i64, scratch_operands = 0 : i64, tpu.core_type = #tpu.core_type<tc>, window_params = [{transform_indices = @transform_0, window_bounds = array<i64: 36, 512>}, {pipeline_mode = #tpu.pipeline_mode<synchronous>, transform_indices = @transform_1, window_bounds = array<i64: 16, 36>}, {transform_indices = @transform_2, window_bounds = array<i64: 16, 512>}, {transform_indices = @transform_3, window_bounds = array<i64: 1, 16, 2>}]} {
    %c0 = arith.constant 0 : index
    %c0_0 = arith.constant 0 : index
    %0 = vector.load %arg2[%c0, %c0_0] : memref<16x36xf32, #tpu.memory_space<vmem>>, vector<16x36xf32>
    %c0_1 = arith.constant 0 : index
    %c0_2 = arith.constant 0 : index
    %1 = vector.load %arg1[%c0_1, %c0_2] : memref<36x512xf32, #tpu.memory_space<vmem>>, vector<36x512xf32>
    %cst = arith.constant dense<0.000000e+00> : vector<16x512xf32>
    %2 = tpu.matmul %0, %1, %cst {dimension_numbers = #tpu.dot_dimension_numbers<[1], [0], [0], [1], [0, 0, 1, 1], [], []>} : vector<16x36xf32>, vector<36x512xf32>, vector<16x512xf32> -> vector<16x512xf32>
    %cst_3 = arith.constant 0.000000e+00 : f32
    %3 = vector.broadcast %cst_3 : f32 to vector<16x512xf32>
    %4 = arith.cmpf ogt, %2, %3 : vector<16x512xf32>
    %cst_4 = arith.constant 0.00999999977 : f32
    %5 = vector.broadcast %cst_4 : f32 to vector<16x512xf32>
    %6 = arith.mulf %5, %2 : vector<16x512xf32>
    %7 = arith.select %4, %2, %6 : vector<16x512xi1>, vector<16x512xf32>
    %c0_5 = arith.constant 0 : index
    %c0_6 = arith.constant 0 : index
    %8 = vector.load %arg3[%c0_5, %c0_6] : memref<16x512xf32, #tpu.memory_space<vmem>>, vector<16x512xf32>
    tpu.vector_store %arg3[%c0_5, %c0_6], %7 {strides = array<i32>} : memref<16x512xf32, #tpu.memory_space<vmem>>, vector<16x512xf32>,
    %9 = tpu.iota {dimensions = array<i32: 1>} : vector<16x512xi32>
    %c512_i32 = arith.constant 512 : i32
    %10 = arith.muli %arg0, %c512_i32 : i32
    %11 = vector.broadcast %10 : i32 to vector<16x512xi32>
    %12 = arith.addi %11, %9 : vector<16x512xi32>
    %c392_i32 = arith.constant 392 : i32
    %13 = vector.broadcast %c392_i32 : i32 to vector<16x512xi32>
    %14 = arith.cmpi slt, %12, %13 : vector<16x512xi32>
    %cst_7 = arith.constant 0.000000e+00 : f32
    %15 = vector.broadcast %cst_7 : f32 to vector<16x512xf32>
    %16 = arith.select %14, %7, %15 : vector<16x512xi1>, vector<16x512xf32>
    %cst_8 = arith.constant dense<0.000000e+00> : vector<16xf32>
    %17 = vector.multi_reduction <add>, %16, %cst_8 [1] : vector<16x512xf32> to vector<16xf32>
    %18 = vector.shape_cast %17 : vector<16xf32> to vector<16x1xf32>
    %19 = vector.shape_cast %18 : vector<16x1xf32> to vector<1x16x1xf32>
    %c0_9 = arith.constant 0 : index
    %c0_10 = arith.constant 0 : index
    %c0_11 = arith.constant 0 : index
    %20 = vector.load %arg4[%c0_9, %c0_10, %c0_11] : memref<1x16x2xf32, #tpu.memory_space<vmem>>, vector<1x16x1xf32>
    tpu.vector_store %arg4[%c0_9, %c0_10, %c0_11], %19 {strides = array<i32>} : memref<1x16x2xf32, #tpu.memory_space<vmem>>, vector<1x16x1xf32>,
    %21 = arith.mulf %16, %16 : vector<16x512xf32>
    %cst_12 = arith.constant dense<0.000000e+00> : vector<16xf32>
    %22 = vector.multi_reduction <add>, %21, %cst_12 [1] : vector<16x512xf32> to vector<16xf32>
    %23 = vector.shape_cast %22 : vector<16xf32> to vector<16x1xf32>
    %24 = vector.shape_cast %23 : vector<16x1xf32> to vector<1x16x1xf32>
    %c0_13 = arith.constant 0 : index
    %c0_14 = arith.constant 0 : index
    %c1 = arith.constant 1 : index
    %25 = vector.load %arg4[%c0_13, %c0_14, %c1] : memref<1x16x2xf32, #tpu.memory_space<vmem>>, vector<1x16x1xf32>
    tpu.vector_store %arg4[%c0_13, %c0_14, %c1], %24 {strides = array<i32>} : memref<1x16x2xf32, #tpu.memory_space<vmem>>, vector<1x16x1xf32>,
    return
  }
  func.func @transform_0(%arg0: i32) -> (i32, i32) {
    %c0_i32 = arith.constant 0 : i32
    %c0_i32_0 = arith.constant 0 : i32
    return %c0_i32, %arg0 : i32, i32
  }
  func.func @transform_1(%arg0: i32) -> (i32, i32) {
    %c0_i32 = arith.constant 0 : i32
    %c0_i32_0 = arith.constant 0 : i32
    %c0_i32_1 = arith.constant 0 : i32
    return %c0_i32, %c0_i32_0 : i32, i32
  }
  func.func @transform_2(%arg0: i32) -> (i32, i32) {
    %c0_i32 = arith.constant 0 : i32
    %c0_i32_0 = arith.constant 0 : i32
    return %c0_i32, %arg0 : i32, i32
  }
  func.func @transform_3(%arg0: i32) -> (i32, i32, i32) {
    %c0_i32 = arith.constant 0 : i32
    %c0_i32_0 = arith.constant 0 : i32
    %c0_i32_1 = arith.constant 0 : i32
    return %arg0, %c0_i32, %c0_i32_0 : i32, i32, i32
  }
}

</mosaic_0001>

<bundles_post_ra>
// kernel: tpu_custom_call.1
= control target key start
LH: loop header
LB: loop body
LE: loop exit
PB: predicated region body
PF: predicated region fallthrough
CT: control target
= control target key end

     0   :  { %9 = vsyncpa [#allocation3], 0  ;;  %s538_s0 = inlined_call_operand.hbm [shape: f32[36,512], index: 0, kind: input, shape index: {}]   ;;  %s539_s1 = inlined_call_operand.hbm [shape: f32[16,36], index: 1, kind: input, shape index: {}]   ;;  %s540_s2 = inlined_call_operand.hbm [shape: f32[16,512], index: 2, kind: output, shape index: {0}]   ;;  %s541_s3 = inlined_call_operand.vmem [shape: f32[1,16,2], index: 3, kind: output, shape index: {1}]  }
   0x1   :  { %10 = vsyncpa [#allocation6], 0 }
   0x2   :  { %11 = vsyncpa [#allocation4], 0  ;;  %s453_s12 = smov [#allocation2]   ;;  %s381_s16 = scalar_lea.hbm %s538_s0, 2560 }
   0x3   :  { %s17_s13 = sshll.u32 %s453_s12, 4  ;;  %p382_p0 = scmp.ne.s32.totalorder %s538_s0, %s381_s16  ;;  %s18_s13 = int_to_ptr.vmem [resolvable:$true] %s17_s13 }
   0x4   :  { %p385_p1 = scmp.lt.u32.totalorder %s381_s16, %s538_s0 }
   0x6   :  { %p387_p2 = pnand %p385_p1, %p382_p0 }
   0x8   :  { %390 = shalt.err (!%p387_p2)
}
   0x9   :  { %s391_s21 = scalar_lea.vmem %s18_s13, 2560  ;;  %p396_p4 = scmp.lt.s32.totalorder %s18_s13, %s18_s13 }
   0xa   :  { %p392_p3 = scmp.ne.s32.totalorder %s18_s13, %s391_s21  ;;  %p397_p5 = scmp.lt.s32.totalorder %s391_s21, %s391_s21 }
   0xc   :  { %p398_p6 = por %p397_p5, %p396_p4 }
   0xe   :  { %p399_p7 = pnand %p398_p6, %p392_p3 }
  0x10   :  { %402 = shalt.err (!%p399_p7)
}
  0x11   :  { %s454_s22 = smov 512   ;;  %s455_s23 = smov 32  }
  0x12   :  { %23 = dma.hbm_to_vmem [thread:$0]  %s538_s0, 2560, %s18_s13, [#allocation3], %s454_s22, %s454_s22, %s455_s23  }
  0x13   :  { %s456_s26 = smov [#allocation5]   ;;  %s403_s30 = scalar_lea.hbm %s539_s1, 256 }
  0x14   :  { %s29_s27 = sshll.u32 %s456_s26, 4  ;;  %p404_p8 = scmp.ne.s32.totalorder %s539_s1, %s403_s30  ;;  %s30_s27 = int_to_ptr.vmem [resolvable:$true] %s29_s27 }
  0x15   :  { %p407_p9 = scmp.lt.u32.totalorder %s403_s30, %s539_s1 }
  0x17   :  { %p409_p10 = pnand %p407_p9, %p404_p8 }
  0x19   :  { %412 = shalt.err (!%p409_p10)
}
  0x1a   :  { %s413_s8 = scalar_lea.vmem %s30_s27, 256  ;;  %p418_p12 = scmp.lt.s32.totalorder %s30_s27, %s30_s27 }
  0x1b   :  { %p414_p11 = scmp.ne.s32.totalorder %s30_s27, %s413_s8  ;;  %p419_p13 = scmp.lt.s32.totalorder %s413_s8, %s413_s8 }
  0x1d   :  { %p420_p0 = por %p419_p13, %p418_p12 }
  0x1f   :  { %p421_p1 = pnand %p420_p0, %p414_p11 }
  0x21   :  { %424 = shalt.err (!%p421_p1)
}
  0x22   :  { %s457_s0 = smov 128   ;;  %s458_s9 = smov 8  }
  0x23   :  { %35 = dma.hbm_to_vmem [thread:$0]  %s539_s1, 256, %s30_s27, [#allocation6], %s457_s0, %s457_s0, %s458_s9  }
  0x24   :  { %447 = dma.done.wait [#allocation3], 2560  }
  0x25   :  { %448 = vsyncadd [#allocation3], 4294964736 }
  0x26   :  { %449 = dma.done.wait [#allocation6], 256  }
  0x27   :  { %450 = vsyncadd [#allocation6], 4294967040  ;;  %v459_v0 = vmov 0.0   ;;  %v45_v1 = vld [vmem:[#allocation2 + $0x8] sm:$0xff]  ;;  %v47_v3 = vld [vmem:[#allocation2 + $0x18] sm:$0xff]  ;;  %vm71_vm0 = vcmask 1043456   ;;  %v270_v31 = vlaneseq }
  0x28   :  { %148 = vmatprep.mubr.f32.mxu0 %v459_v0  ;;  %225 = vmatprep.mubr.f32.mxu1 %v459_v0  ;;  %v49_v2 = vld [vmem:[#allocation2 + $0x28] sm:$0xff]  ;;  %v51_v5 = vld [vmem:[#allocation2 + $0x38] sm:$0xff]  ;;  %v44_v6 = vld [vmem:[#allocation2] sm:$0xff]  ;;  %vm64_vm1 = vcmask 293888   ;;  %s460_s1 = smov [#allocation7]  }
  0x29   :  { %v357_v4 = vpack.c.bf16 %v49_v2, %v45_v1  ;;  %v48_v7 = vld [vmem:[#allocation2 + $0x20] sm:$0xff]  ;;  %v365_v8 = vpack.c.bf16 %v51_v5, %v47_v3  ;;  %v46_v10 = vld [vmem:[#allocation2 + $0x10] sm:$0xff]  ;;  %v53_v12 = vld [vmem:[#allocation2 + $0x48] sm:$0xff]  ;;  %v271_v32 = vand.u32 127, %v270_v31  ;;  %s332_s12 = sshll.u32 %s460_s1, 4  ;;  %s333_s12 = int_to_ptr.vmem [resolvable:$true] %s332_s12 }
  0x2a   :  { %v359_v9 = vpack.c.bf16 %v48_v7, %v44_v6  ;;  %v50_v11 = vld [vmem:[#allocation2 + $0x30] sm:$0xff]  ;;  %v57_v14 = vld [vmem:[#allocation2 + $0x68] sm:$0xff]  ;;  %v55_v15 = vld [vmem:[#allocation2 + $0x58] sm:$0xff]  ;;  %s425_s13 = scalar_lea.vmem %s333_s12, 1024  ;;  %p430_p3 = scmp.lt.s32.totalorder %s333_s12, %s333_s12 }
  0x2b   :  { %358 = vmatprep.subr.bf16.mxu0 %v357_v4  ;;  %v367_v13 = vpack.c.bf16 %v50_v11, %v46_v10  ;;  %v59_v16 = vld [vmem:[#allocation2 + $0x78] sm:$0xff]  ;;  %366 = vmatprep.subr.bf16.mxu1 %v365_v8  ;;  %v361_v17 = vpack.c.bf16 %v57_v14, %v53_v12  ;;  %v52_v19 = vld [vmem:[#allocation2 + $0x40] sm:$0xff]  ;;  %v54_v21 = vld [vmem:[#allocation2 + $0x50] sm:$0xff]  ;;  %v274_v33 = vadd.s32 384, %v271_v32  ;;  %p426_p2 = scmp.ne.s32.totalorder %s333_s12, %s425_s13  ;;  %p431_p4 = scmp.lt.s32.totalorder %s425_s13, %s425_s13 }
  0x2c   :  { %360 = vmatpush1.bf16.msra.mxu0 %v359_v9  ;;  %v369_v18 = vpack.c.bf16 %v59_v16, %v55_v15  ;;  %v56_v20 = vld [vmem:[#allocation2 + $0x60] sm:$0xff]  ;;  %v58_v23 = vld [vmem:[#allocation2 + $0x70] sm:$0xff]  ;;  %v61_v25 = vld [vmem:[#allocation2 + $0x88] sm:$0xf] }
  0x2d   :  { %368 = vmatpush1.bf16.msra.mxu1 %v367_v13  ;;  %v363_v22 = vpack.c.bf16 %v56_v20, %v52_v19  ;;  %362 = vmatprep.subr.bf16.mxu0 %v361_v17  ;;  %v371_v24 = vpack.c.bf16 %v58_v23, %v54_v21  ;;  %v63_v26 = vld [vmem:[#allocation2 + $0x98] sm:$0xf]  ;;  %v60_v27 = vld [vmem:[#allocation2 + $0x80] sm:$0xf]  ;;  %v62_v28 = vld [vmem:[#allocation2 + $0x90] sm:$0xf]  ;;  %p432_p5 = por %p431_p4, %p430_p3 }
  0x2e   :  { %370 = vmatprep.subr.bf16.mxu1 %v369_v18  ;;  %v42_v29 = vld [vmem:[#allocation5] sm:$0xff]  ;;  %v43_v30 = vld [vmem:[#allocation5 + $0x8] sm:$0xff]  ;;  %vm284_vm5 = vcmp.lt.s32.totalorder %v274_v33, 392 }
  0x2f   :  { %p433_p6 = pnand %p432_p5, %p426_p2 }
  0x30   :  { %364 = vmatpush1.bf16.msra.mxu0 %v363_v22 }
  0x31   :  { %372 = vmatpush1.bf16.msra.mxu1 %v371_v24  ;;  %349 = vmatprep.subr.msk.mxu0 %vm71_vm0, %v61_v25 }
  0x32   :  { %353 = vmatprep.subr.msk.mxu1 %vm71_vm0, %v63_v26 }
  0x34   :  { %350 = vmatpush1.msk.msra.mxu0 %vm71_vm0, %v60_v27 }
  0x35   :  { %354 = vmatpush1.msk.msra.mxu1 %vm71_vm0, %v62_v28  ;;  %351 = vmatmul.mubr.msk.f32.vlgmr.msra.gmra.mrb[0].mxu0 %vm64_vm1, %v42_v29 }
  0x36   :  { %355 = vmatmul.mubr.msk.f32.vlgmr.msra.gmra.mrb[0].mxu1 %vm64_vm1, %v42_v29  ;;  %154 = vmatprep.mubr.f32.mxu0 %v459_v0 }
  0x37   :  { %231 = vmatprep.mubr.f32.mxu1 %v459_v0 }
  0x39   :  { %352 = vmatmul.mubr.msk.f32.gmra.mrb[2].mxu0 %vm64_vm1, %v43_v30 }
  0x3a   :  { %356 = vmatmul.mubr.msk.f32.gmra.mrb[2].mxu1 %vm64_vm1, %v43_v30 }
 0x108   :  { %v150_v34 = vpop.f32.mrb[0].mxu0 }
 0x109   :  { %vm238_vm2 = vcmp.gt.f32.partialorder %v150_v34, 0.0  ;;  %v246_v35 = vmul.f32 0.01, %v150_v34  ;;  %v227_v36 = vpop.f32.mrb[0].mxu1  ;;  %v152_v37 = vpop.f32.mrb[1].mxu0 }
 0x10a   :  { %vm240_vm3 = vcmp.gt.f32.partialorder %v227_v36, 0.0  ;;  %v248_v38 = vmul.f32 0.01, %v227_v36  ;;  %vm239_vm4 = vcmp.gt.f32.partialorder %v152_v37, 0.0  ;;  %v247_v39 = vmul.f32 0.01, %v152_v37 }
 0x10b   :  { %v254_v40 = vsel %vm238_vm2, %v150_v34, %v246_v35  ;;  %v229_v41 = vpop.f32.mrb[1].mxu1 }
 0x10c   :  { %262 = vst [vmem:[#allocation7] sm:$0xff] %v254_v40  ;;  %v306_v42 = vmul.f32 %v254_v40, %v254_v40  ;;  %v256_v43 = vsel %vm240_vm3, %v227_v36, %v248_v38  ;;  %v255_v44 = vsel %vm239_vm4, %v152_v37, %v247_v39  ;;  %vm241_vm6 = vcmp.gt.f32.partialorder %v229_v41, 0.0  ;;  %v156_v45 = vpop.f32.mrb[2].mxu0 }
 0x10d   :  { %264 = vst [vmem:[#allocation7 + $0x10] sm:$0xff] %v256_v43  ;;  %263 = vst [vmem:[#allocation7 + $0x8] sm:$0xff] %v255_v44  ;;  %v307_v46 = vmul.f32 %v255_v44, %v255_v44  ;;  %v249_v47 = vmul.f32 0.01, %v229_v41  ;;  %vm242_vm7 = vcmp.gt.f32.partialorder %v156_v45, 0.0  ;;  %v233_v49 = vpop.f32.mrb[2].mxu1  ;;  %v293_v53 = vadd.f32 %v255_v44, %v254_v40 }
 0x10e   :  { %v250_v48 = vmul.f32 0.01, %v156_v45  ;;  %vm244_vm8 = vcmp.gt.f32.partialorder %v233_v49, 0.0  ;;  %v252_v50 = vmul.f32 0.01, %v233_v49  ;;  %v158_v51 = vpop.f32.mrb[3].mxu0  ;;  %v308_v54 = vmul.f32 %v256_v43, %v256_v43 }
 0x10f   :  { %v235_v52 = vpop.f32.mrb[3].mxu1  ;;  %vm243_vm9 = vcmp.gt.f32.partialorder %v158_v51, 0.0  ;;  %v251_v56 = vmul.f32 0.01, %v158_v51  ;;  %v257_v60 = vsel %vm241_vm6, %v229_v41, %v249_v47  ;;  %v294_v63 = vadd.f32 %v293_v53, %v256_v43 }
 0x110   :  { %v258_v55 = vsel %vm242_vm7, %v156_v45, %v250_v48  ;;  %vm245_vm10 = vcmp.gt.f32.partialorder %v235_v52, 0.0  ;;  %v260_v58 = vsel %vm244_vm8, %v233_v49, %v252_v50  ;;  %v253_v59 = vmul.f32 0.01, %v235_v52  ;;  %265 = vst [vmem:[#allocation7 + $0x18] sm:$0xff] %v257_v60 }
 0x111   :  { %266 = vst [vmem:[#allocation7 + $0x20] sm:$0xff] %v258_v55  ;;  %v310_v57 = vmul.f32 %v258_v55, %v258_v55  ;;  %268 = vst [vmem:[#allocation7 + $0x30] sm:$0xff] %v260_v58  ;;  %v259_v61 = vsel %vm243_vm9, %v158_v51, %v251_v56  ;;  %v288_v62 = vsel %vm284_vm5, %v257_v60, 0.0  ;;  %v314_v0 = vadd.f32 %v307_v46, %v306_v42 }
 0x112   :  { %267 = vst [vmem:[#allocation7 + $0x28] sm:$0xff] %v259_v61  ;;  %v298_v1 = vadd.f32 %v259_v61, %v258_v55  ;;  %v311_v2 = vmul.f32 %v259_v61, %v259_v61  ;;  %v261_v3 = vsel %vm245_vm10, %v235_v52, %v253_v59  ;;  %v295_v4 = vadd.f32 %v294_v63, %v288_v62 }
 0x113   :  { %269 = vst [vmem:[#allocation7 + $0x38] sm:$0xff] %v261_v3  ;;  %v309_v5 = vmul.f32 %v288_v62, %v288_v62  ;;  %v315_v6 = vadd.f32 %v314_v0, %v308_v54  ;;  %v292_v7 = vsel %vm284_vm5, %v261_v3, 0.0  ;;  %v312_v9 = vmul.f32 %v260_v58, %v260_v58 }
 0x114   :  { %v299_v8 = vadd.f32 %v298_v1, %v260_v58  ;;  %v319_v10 = vadd.f32 %v311_v2, %v310_v57  ;;  %296 = vadd.xlane.f32.xlu0 %v295_v4  ;;  %v313_v13 = vmul.f32 %v292_v7, %v292_v7 }
 0x115   :  { %v316_v11 = vadd.f32 %v315_v6, %v309_v5 }
 0x116   :  { %v300_v12 = vadd.f32 %v299_v8, %v292_v7  ;;  %v320_v14 = vadd.f32 %v319_v10, %v312_v9 }
 0x117   :  { %317 = vadd.xlane.f32.xlu1 %v316_v11 }
 0x118   :  { %v321_v15 = vadd.f32 %v320_v14, %v313_v13  ;;  %301 = vadd.xlane.f32.xlu0 %v300_v12 }
 0x11b   :  { %322 = vadd.xlane.f32.xlu1 %v321_v15 }
 0x11c   :  { %436 = shalt.err (!%p433_p6)
}
 0x11d   :  { %s437_s16 = scalar_lea.hbm %s540_s2, 1024 }
 0x11e   :  { %p438_p7 = scmp.ne.s32.totalorder %s540_s2, %s437_s16  ;;  %p441_p8 = scmp.lt.u32.totalorder %s437_s16, %s540_s2 }
 0x120   :  { %p443_p9 = pnand %p441_p8, %p438_p7 }
 0x122   :  { %446 = shalt.err (!%p443_p9)
}
 0x123   :  { %338 = dma.vmem_to_hbm [thread:$0]  %s333_s12, 1024, %s540_s2, [#allocation4], %s454_s22, %s454_s22, %s455_s23   ;;  %vm303_vm11 = vcmask 7168   ;;  %vm324_vm12 = vcmask 15368  }
 0x1a1   :  { %v297_v16 = vpop.xlane.xlu0 %296 }
 0x1a2   :  { %304 = vst.msk [vmem:[%s541_s3] sm:$0xff] %vm303_vm11, %v297_v16 }
 0x1a4   :  { %v318_v17 = vpop.xlane.xlu1 %317 }
 0x1a5   :  { %325 = vst.msk [vmem:[%s541_s3] sm:$0xff] %vm324_vm12, %v318_v17  ;;  %v302_v18 = vpop.xlane.xlu0 %301 }
 0x1a6   :  { %305 = vst.msk [vmem:[%s541_s3 + $0x8] sm:$0xff] %vm303_vm11, %v302_v18 }
 0x1a8   :  { %v323_v19 = vpop.xlane.xlu1 %322 }
 0x1a9   :  { %326 = vst.msk [vmem:[%s541_s3 + $0x8] sm:$0xff] %vm324_vm12, %v323_v19 }
 0x1aa   :  { %451 = dma.done.wait [#allocation4], 1024  }
 0x1ab   :  { %452 = vsyncadd [#allocation4], 4294966272 }
 0x1ac   :  { %346 = vsyncpa [#allocation3], 1 }
 0x1ad   :  { %347 = vsyncpa [#allocation6], 1 }
 0x1ae   :  { %348 = vsyncpa [#allocation4], 1 }

</bundles_post_ra>
